<compile_context>
chip_gen: v5e
topology: v5e:2x2
jax: 0.10.0
libtpu: 0.0.40
codegen_flags: <defaults>
</compile_context>

<pallas_src>
import functools
import numpy as np
import jax
import jax.numpy as jnp
from jax.experimental import pallas as pl
from jax.experimental.pallas import tpu as pltpu

# ----------------------------- module config (defaults of the PyTorch module) ---
NPIX = 32
FOV = 160.0
R_RANGE = (10.0, 40.0)
WIDTH_RANGE = (1.0, 40.0)
FLUX_RANGE = (0.8, 1.2)
NPARAMS = 4                 # flux_flag=False (module default) -> 4 normalized params

P = 5                       # packed per-batch scalars: [r, -0.5/sigma^2, s*cos(eta), s*sin(eta), flux]
LANES = 128
SUBL = (NPIX * NPIX) // LANES          # 8 -> each image is exactly one (8, 128) f32 slab
assert NPIX * NPIX == SUBL * LANES


# ----------------------------- host-side constant grids --------------------------
def _build_grids(npix):
    gap = 1.0 / npix
    xs = ((-1.0 + gap) + 2.0 * gap * np.arange(npix)).astype(np.float32)
    grid_y, grid_x = np.meshgrid(-xs, xs, indexing="ij")   # matches torch.meshgrid default ('ij')
    grid_r = np.sqrt(grid_x ** 2 + grid_y ** 2).astype(np.float32)
    grid_theta = np.arctan2(grid_y, grid_x).astype(np.float32)
    return grid_r, grid_theta


GRID_R_NP, GRID_THETA_NP = _build_grids(NPIX)
# One stacked, lane-dense constant tile: [grid_r ; cos(theta) ; sin(theta)].
CONST_TILES_NP = np.stack(
    [GRID_R_NP.reshape(SUBL, LANES),
     np.cos(GRID_THETA_NP).reshape(SUBL, LANES).astype(np.float32),
     np.sin(GRID_THETA_NP).reshape(SUBL, LANES).astype(np.float32)],
    axis=0).astype(np.float32)                              # (3, SUBL, LANES)


# ----------------------------- Pallas kernel ------------------------------------
def _crescent_kernel(TB, pvec_ref, const_ref, out_ref):
    # pvec_ref : (B_pad * P,) f32 in SMEM (scalar prefetch) -> scalar reads only.
    # const_ref: (3, SUBL, LANES) f32 constant tiles: grid_r, cos(theta), sin(theta).
    # out_ref  : (TB, SUBL, LANES) f32 lane-dense image slabs for TB batch elements.
    gr = const_ref[0]
    ct = const_ref[1]
    st = const_ref[2]
    block = pl.program_id(0)
    for b in range(TB):                       # static unroll; TB is small (<= 8)
        base = (block * TB + b) * P
        r = pvec_ref[base + 0]
        w = pvec_ref[base + 1]                # -0.5 / sigma^2
        sc = pvec_ref[base + 2]               # s * cos(eta)
        ss = pvec_ref[base + 3]               # s * sin(eta)
        fl = pvec_ref[base + 4]               # flux (1.0 when flux_flag=False)

        diff = gr - r
        ring = jnp.exp(w * (diff * diff))     # only per-pixel EUP op
        S = 1.0 + sc * ct + ss * st           # == 1 + s*cos(theta - eta)
        img = S * ring

        total = jnp.sum(img, keepdims=True)                 # (1, 1) cross-lane reduce (XLU)
        scale = fl * pl.reciprocal(total, approx=True)      # EUP vrcp, no f32 divide
        out_ref[b] = img * scale


# ----------------------------- wrapper ------------------------------------------
@functools.partial(jax.jit, static_argnames=("flux_flag",))
def crescent_param2img(params, flux_flag=False):
    """params: (B, 4|5) f32 in [0, 1] -> crescent image (B, NPIX, NPIX) f32."""
    params = params.astype(jnp.float32)
    B = params.shape[0]

    # ---- compute_features (tiny per-batch math; fused with the pallas_call) ----
    half_fov = 0.5 * FOV
    r = R_RANGE[0] / half_fov + params[:, 0] * (R_RANGE[1] - R_RANGE[0]) / half_fov
    sigma = WIDTH_RANGE[0] / half_fov + params[:, 1] * (WIDTH_RANGE[1] - WIDTH_RANGE[0]) / half_fov
    s = params[:, 2]
    eta = np.float32(181.0 / 180.0 * np.pi) * (2.0 * params[:, 3] - 1.0)
    if flux_flag:
        flux = FLUX_RANGE[0] + (FLUX_RANGE[1] - FLUX_RANGE[0]) * params[:, 4]
    else:
        flux = jnp.ones((B,), jnp.float32)

    w = -0.5 / (sigma * sigma)         # precomputed exponent scale (kills per-pixel divide)
    sc = s * jnp.cos(eta)              # cos(theta - eta) = cos(t)cos(eta) + sin(t)sin(eta)
    ss = s * jnp.sin(eta)
    pvec = jnp.stack([r, w, sc, ss, flux], axis=1).astype(jnp.float32)     # (B, P)

    # ---- batch blocking: amortize per-step overhead, keep >= 2 steps when B >= 2 ----
    TB = max(1, min(8, B // 2)) if B >= 2 else 1
    B_pad = ((B + TB - 1) // TB) * TB
    if B_pad != B:
        # benign zero padding: ring = 1, S = 1, flux = 0 -> padded outputs are 0 and discarded
        pvec = jnp.concatenate([pvec, jnp.zeros((B_pad - B, P), jnp.float32)], axis=0)
    pvec_flat = pvec.reshape(B_pad * P)

    out = pl.pallas_call(
        functools.partial(_crescent_kernel, TB),
        out_shape=jax.ShapeDtypeStruct((B_pad, SUBL, LANES), jnp.float32),
        grid_spec=pltpu.PrefetchScalarGridSpec(
            num_scalar_prefetch=1,                           # pvec_flat -> SMEM
            grid=(B_pad // TB,),
            in_specs=[
                pl.BlockSpec((3, SUBL, LANES), lambda i, pv: (0, 0, 0)),   # constant tiles
            ],
            out_specs=pl.BlockSpec((TB, SUBL, LANES), lambda i, pv: (i, 0, 0)),
        ),
        compiler_params=pltpu.CompilerParams(dimension_semantics=("parallel",)),
    )(pvec_flat, jnp.asarray(CONST_TILES_NP))

    return out[:B].reshape(B, NPIX, NPIX)


# ----------------------------- pure-JAX reference (matches the PyTorch forward) --
def crescent_reference(params, flux_flag=False):
    params = params.astype(jnp.float32)
    grid_r = jnp.asarray(GRID_R_NP)[None]
    grid_theta = jnp.asarray(GRID_THETA_NP)[None]
    half_fov = 0.5 * FOV
    r = (R_RANGE[0] / half_fov + params[:, 0] * (R_RANGE[1] - R_RANGE[0]) / half_fov)[:, None, None]
    sigma = (WIDTH_RANGE[0] / half_fov + params[:, 1] * (WIDTH_RANGE[1] - WIDTH_RANGE[0]) / half_fov)[:, None, None]
    s = params[:, 2][:, None, None]
    eta = (181.0 / 180.0 * np.pi * (2.0 * params[:, 3] - 1.0))[:, None, None]
    ring = jnp.exp(-0.5 * (grid_r - r) ** 2 / sigma ** 2)
    S = 1.0 + s * jnp.cos(grid_theta - eta)
    crescent = S * ring
    out = crescent / jnp.sum(crescent, axis=(-1, -2), keepdims=True)
    if flux_flag:
        flux = (FLUX_RANGE[0] + (FLUX_RANGE[1] - FLUX_RANGE[0]) * params[:, 4])[:, None, None]
        out = flux * out
    return out


# ----------------------------- main ----------------------------------------------
if __name__ == "__main__":
    B = 2
    key = jax.random.PRNGKey(0)
    # normalized parameters in [0, 1], shape (B, nparams) = (2, 4)  (flux_flag=False default)
    params = jax.random.uniform(key, (B, NPARAMS), dtype=jnp.float32)

    out = jax.block_until_ready(crescent_param2img(params))
    ref = jax.block_until_ready(crescent_reference(params))

    np.testing.assert_allclose(np.asarray(out), np.asarray(ref), rtol=2e-3, atol=1e-6)
    assert np.isfinite(np.asarray(out)).all()

    print("KERNEL_OK")
</pallas_src>

<mosaic_0001>
module attributes {stable_mosaic.version = 11 : i64} {
  func.func @_crescent_kernel(%arg0: i32, %arg1: memref<10xf32, #tpu.memory_space<smem>>, %arg2: memref<3x8x128xf32, #tpu.memory_space<vmem>>, %arg3: memref<1x8x128xf32, #tpu.memory_space<vmem>>) attributes {dimension_semantics = [#tpu.dimension_semantics<parallel>], iteration_bounds = array<i64: 2>, scalar_prefetch = 1 : i64, scratch_operands = 0 : i64, tpu.core_type = #tpu.core_type<tc>, window_params = [{pipeline_mode = #tpu.pipeline_mode<synchronous>, transform_indices = @transform_0, window_bounds = array<i64: 3, 8, 128>}, {transform_indices = @transform_1, window_bounds = array<i64: 1, 8, 128>}]} {
    %c0 = arith.constant 0 : index
    %c0_0 = arith.constant 0 : index
    %c0_1 = arith.constant 0 : index
    %0 = vector.load %arg2[%c0, %c0_0, %c0_1] : memref<3x8x128xf32, #tpu.memory_space<vmem>>, vector<1x8x128xf32>
    %1 = vector.shape_cast %0 : vector<1x8x128xf32> to vector<8x128xf32>
    %c1 = arith.constant 1 : index
    %c0_2 = arith.constant 0 : index
    %c0_3 = arith.constant 0 : index
    %2 = vector.load %arg2[%c1, %c0_2, %c0_3] : memref<3x8x128xf32, #tpu.memory_space<vmem>>, vector<1x8x128xf32>
    %3 = vector.shape_cast %2 : vector<1x8x128xf32> to vector<8x128xf32>
    %c2 = arith.constant 2 : index
    %c0_4 = arith.constant 0 : index
    %c0_5 = arith.constant 0 : index
    %4 = vector.load %arg2[%c2, %c0_4, %c0_5] : memref<3x8x128xf32, #tpu.memory_space<vmem>>, vector<1x8x128xf32>
    %5 = vector.shape_cast %4 : vector<1x8x128xf32> to vector<8x128xf32>
    %c1_i32 = arith.constant 1 : i32
    %6 = arith.muli %arg0, %c1_i32 : i32
    %c0_i32 = arith.constant 0 : i32
    %7 = arith.addi %6, %c0_i32 : i32
    %c5_i32 = arith.constant 5 : i32
    %8 = arith.muli %7, %c5_i32 : i32
    %c0_i32_6 = arith.constant 0 : i32
    %9 = arith.addi %8, %c0_i32_6 : i32
    %10 = arith.index_cast %9 : i32 to index
    %11 = memref.load %arg1[%10] : memref<10xf32, #tpu.memory_space<smem>>
    %c1_i32_7 = arith.constant 1 : i32
    %12 = arith.addi %8, %c1_i32_7 : i32
    %13 = arith.index_cast %12 : i32 to index
    %14 = memref.load %arg1[%13] : memref<10xf32, #tpu.memory_space<smem>>
    %c2_i32 = arith.constant 2 : i32
    %15 = arith.addi %8, %c2_i32 : i32
    %16 = arith.index_cast %15 : i32 to index
    %17 = memref.load %arg1[%16] : memref<10xf32, #tpu.memory_space<smem>>
    %c3_i32 = arith.constant 3 : i32
    %18 = arith.addi %8, %c3_i32 : i32
    %19 = arith.index_cast %18 : i32 to index
    %20 = memref.load %arg1[%19] : memref<10xf32, #tpu.memory_space<smem>>
    %c4_i32 = arith.constant 4 : i32
    %21 = arith.addi %8, %c4_i32 : i32
    %22 = arith.index_cast %21 : i32 to index
    %23 = memref.load %arg1[%22] : memref<10xf32, #tpu.memory_space<smem>>
    %24 = vector.broadcast %11 : f32 to vector<8x128xf32>
    %25 = arith.subf %1, %24 : vector<8x128xf32>
    %26 = arith.mulf %25, %25 : vector<8x128xf32>
    %27 = vector.broadcast %14 : f32 to vector<8x128xf32>
    %28 = arith.mulf %27, %26 : vector<8x128xf32>
    %29 = math.exp %28 : vector<8x128xf32>
    %30 = vector.broadcast %17 : f32 to vector<8x128xf32>
    %31 = arith.mulf %30, %3 : vector<8x128xf32>
    %cst = arith.constant 1.000000e+00 : f32
    %32 = vector.broadcast %cst : f32 to vector<8x128xf32>
    %33 = arith.addf %32, %31 : vector<8x128xf32>
    %34 = vector.broadcast %20 : f32 to vector<8x128xf32>
    %35 = arith.mulf %34, %5 : vector<8x128xf32>
    %36 = arith.addf %33, %35 : vector<8x128xf32>
    %37 = arith.mulf %36, %29 : vector<8x128xf32>
    %38 = vector.shape_cast %37 : vector<8x128xf32> to vector<1x8x128xf32>
    %cst_8 = arith.constant dense<0.000000e+00> : vector<1xf32>
    %39 = vector.multi_reduction <add>, %38, %cst_8 [1, 2] : vector<1x8x128xf32> to vector<1xf32>
    %40 = vector.shape_cast %39 : vector<1xf32> to vector<1x1x1xf32>
    %41 = vector.extract %40[0, 0, 0] : f32 from vector<1x1x1xf32>
    %42 = vector.broadcast %41 : f32 to vector<1x1xf32>
    %43 = tpu.reciprocal %42 {approx = true} : vector<1x1xf32> -> vector<1x1xf32>
    %44 = vector.broadcast %23 : f32 to vector<1x1xf32>
    %45 = arith.mulf %44, %43 : vector<1x1xf32>
    %46 = vector.broadcast %45 : vector<1x1xf32> to vector<8x128xf32>
    %47 = arith.mulf %37, %46 : vector<8x128xf32>
    %c0_9 = arith.constant 0 : index
    %c0_10 = arith.constant 0 : index
    %c0_11 = arith.constant 0 : index
    %48 = vector.load %arg3[%c0_9, %c0_10, %c0_11] : memref<1x8x128xf32, #tpu.memory_space<vmem>>, vector<1x8x128xf32>
    %49 = vector.shape_cast %48 : vector<1x8x128xf32> to vector<8x128xf32>
    %50 = vector.shape_cast %47 : vector<8x128xf32> to vector<1x8x128xf32>
    tpu.vector_store %arg3[%c0_9, %c0_10, %c0_11], %50 {strides = array<i32>} : memref<1x8x128xf32, #tpu.memory_space<vmem>>, vector<1x8x128xf32>,
    return
  }
  func.func @transform_0(%arg0: i32, %arg1: memref<10xf32, #tpu.memory_space<smem>>) -> (i32, i32, i32) {
    %c0_i32 = arith.constant 0 : i32
    %c0_i32_0 = arith.constant 0 : i32
    %c0_i32_1 = arith.constant 0 : i32
    %c0_i32_2 = arith.constant 0 : i32
    return %c0_i32, %c0_i32_0, %c0_i32_1 : i32, i32, i32
  }
  func.func @transform_1(%arg0: i32, %arg1: memref<10xf32, #tpu.memory_space<smem>>) -> (i32, i32, i32) {
    %c0_i32 = arith.constant 0 : i32
    %c0_i32_0 = arith.constant 0 : i32
    %c0_i32_1 = arith.constant 0 : i32
    return %arg0, %c0_i32, %c0_i32_0 : i32, i32, i32
  }
}

</mosaic_0001>

<bundles_post_ra>
// kernel: crescent_param2img.1
= control target key start
LH: loop header
LB: loop body
LE: loop exit
PB: predicated region body
PF: predicated region fallthrough
CT: control target
= control target key end

     0   :  { %s235_s12 = smov [#allocation3]   ;;  %s289_s0 = inlined_call_operand.vmem [shape: f32[10], index: 0, kind: input, shape index: {}]   ;;  %s290_s1 = inlined_call_operand.vmem [shape: f32[3,8,128], index: 1, kind: input, shape index: {}]   ;;  %s291_s2 = inlined_call_operand.vmem [shape: f32[2,8,128], index: 2, kind: output, shape index: {}]  }
   0x1   :  { %s8_s11 = sshll.u32 %s289_s0, 4  ;;  %s9_s11 = int_to_ptr.vmem [resolvable:$true] %s8_s11 }
   0x2   :  { %11 = dma.vmem_to_smem %s9_s11, 16, %s235_s12, [#allocation2] }
   0x3   :  { %229 = dma.done.wait [#allocation2], 16 }
   0x4   :  { %230 = vsyncadd [#allocation2], 4294967280 }
   0x5   :  { %14 = sfence }
   0x6   :  { %s254_s13 = smov 0  }
   0x7 LB: > { %s260_s14 = sadd.s32 4294967295, %s233_s13   ;;  %p192_p0 = scmp.ge.s32.totalorder %s233_s13, 1  ;;  %s233_s13 = sphi %s254_s13, %s20_s13  }
   0x8   : > { %p86_p1 = scmp.lt.s32.totalorder %s233_s13, 3 }
   0xa   : > { %p87_p2 = pnand %p192_p0, %p86_p1 }
   0xb   : > { %s265_s0 = smul.u32 (!%p87_p2), 5, %s260_s14  ;;  %p100_p3 = scmp.lt.s32.totalorder (!%p87_p2), %s260_s14, 1 }
   0xc   : > { %90 = sbr.rel (%p87_p2) target bundleno = 228 (0xe4), region = 24 }
   0xd   : > { %s110_s15 = sld [smem:[#allocation3 + %s265_s0]] (!%p87_p2)  ;;  %s111_s16 = sadd.s32 (!%p87_p2), 1, %s265_s0 }
   0xe   : > { %s112_s17 = sld [smem:[#allocation3 + %s111_s16]] (!%p87_p2)  ;;  %s113_s18 = sadd.s32 (!%p87_p2), 2, %s265_s0 }
   0xf   : > { %s114_s19 = sld [smem:[#allocation3 + %s113_s18]] (!%p87_p2)  ;;  %s115_s20 = sadd.s32 (!%p87_p2), 3, %s265_s0 }
  0x10   : > { %s116_s21 = sld [smem:[#allocation3 + %s115_s20]] (!%p87_p2)  ;;  %s117_s28 = sadd.s32 (!%p87_p2), 4, %s265_s0 }
  0x11   : > { %v104_v0 = vld [vmem:[%s290_s1] sm:$0xff]  ;;  %v194_v2 = vld [vmem:[%s290_s1 + $0x8] sm:$0xff]  ;;  %v195_v8 = vld [vmem:[%s290_s1 + $0x10] sm:$0xff]  ;;  %s118_s29 = sld [smem:[#allocation3 + %s117_s28]]  ;;  %s293_s14 = smov (!%p100_p3, %s260_s14), 1 }
  0x12   : > { %s193_s3 = sshll.u32 %s293_s14, 3 }
  0x13   : > { %v119_v1 = vstv %s110_s15  ;;  %s103_s6 = scalar_lea.vmem %s291_s2, %s193_s3 }
  0x14   : > { %v120_v3 = vsub.f32 %v104_v0, %v119_v1  ;;  %v122_v4 = vstv %s112_s17 }
  0x15   : > { %v126_v5 = vstv %s114_s19 }
  0x16   : > { %v121_v6 = vmul.f32 %v120_v3, %v120_v3  ;;  %v127_v7 = vmul.f32 %v194_v2, %v126_v5  ;;  %v129_v10 = vstv %s116_s21 }
  0x17   : > { %v130_v13 = vmul.f32 %v195_v8, %v129_v10  ;;  %v144_v25 = vstv %s118_s29 }
  0x18   : > { %v123_v9 = vmul.f32 %v122_v4, %v121_v6  ;;  %v128_v12 = vadd.f32 1.0, %v127_v7 }
  0x1a   : > { %v124_v11 = vmul.f32 1.442695, %v123_v9  ;;  %v131_v14 = vadd.f32 %v130_v13, %v128_v12 }
  0x1c   : > { %209 = vpow2.f32 %v124_v11 }
  0x22   : > { %v210_v15 = vpop.eup %209 }
  0x23   : > { %v132_v16 = vmul.f32 %v210_v15, %v131_v14 }
  0x25   : > { %133 = vadd.xlane.f32.xlu0 %v132_v16 }
  0x98   : > { %v134_v17 = vpop.xlane.xlu0 %133 }
  0x99   : > { %v135_v18 = vrot.slane %v134_v17, 4 }
  0x9b   : > { %v136_v19 = vadd.f32 %v135_v18, %v134_v17 }
  0x9d   : > { %v137_v20 = vrot.slane %v136_v19, 2 }
  0x9f   : > { %v138_v21 = vadd.f32 %v137_v20, %v136_v19 }
  0xa1   : > { %v139_v22 = vrot.slane %v138_v21, 1 }
  0xa3   : > { %v140_v23 = vadd.f32 %v139_v22, %v138_v21 }
  0xa5   : > { %198 = vpush %v140_v23 }
  0xd6   : > { %s199_s30 = spop %198 }
  0xd7   : > { %v142_v24 = vstv %s199_s30 }
  0xd8   : > { %211 = vrcp.f32 %v142_v24 }
  0xde   : > { %v212_v26 = vpop.eup %211 }
  0xdf   : > { %v145_v27 = vmul.f32 %v212_v26, %v144_v25 }
  0xe1   : > { %v146_v28 = vmul.f32 %v145_v27, %v132_v16 }
  0xe3   : > { %147 = vst [vmem:[%s103_s6] sm:$0xff] %v146_v28 }
  0xe4 PF: > { %s20_s13 = sadd.s32 1, %s233_s13  }
  0xe5   : > { %p17_p4 = scmp.ge.s32.totalorder %s20_s13, 4  }
  0xe7   :  { %19 = sbr.rel (!%p17_p4) target bundleno = 7 (0x7), region = 53 }

</bundles_post_ra>
